<compile_context>
chip_gen: v7x
topology: tpu7x:2x2x1
jax: 0.10.0
libtpu: 0.0.40
codegen_flags: <defaults>
</compile_context>

<pallas_src>
import jax
import jax.numpy as jnp
from jax.experimental import pallas as pl
from jax.experimental.pallas import tpu as pltpu

LAM_U = 0.3
LAM_V = 0.3

_TILE_U = 512     # user rows per tile (sublane axis, multiple of 16 for bf16)
_TILE_I = 2048    # item cols per tile (lane axis, multiple of 128)
_VMEM_LIMIT = 48 * 1024 * 1024   # headroom under v7x's 64 MiB physical VMEM


def _round_up(x, m):
    return ((x + m - 1) // m) * m


def _pmf_kernel(matrix_ref, u_ref, vt_ref, perr_ref):
    j = pl.program_id(1)   # item-tile index (trailing reduction, "arbitrary")

    # Zero the resident per-user-tile accumulator at the start of the item sweep.
    @pl.when(j == 0)
    def _init():
        perr_ref[...] = jnp.zeros_like(perr_ref)

    m = matrix_ref[...].astype(jnp.float32)   # (TU, TI)  bf16 storage -> f32 math
    u = u_ref[...]                            # (TU, K)   f32
    vt = vt_ref[...]                          # (K, TI)   f32 (pre-transposed V)

    # logits = u @ v.T as a canonical (M,K)x(K,N) MXU contraction, f32 accumulation.
    logits = jnp.dot(u, vt, preferred_element_type=jnp.float32)   # (TU, TI)

    # sigmoid(x) = 0.5 * tanh(0.5 * x) + 0.5  -- single EUP transcendental.
    predicted = 0.5 * jnp.tanh(0.5 * logits) + 0.5

    # Fused mask: missing entries (and wrapper padding) carry the -1 sentinel.
    masked_sq = jnp.where(m != -1.0, (m - predicted) ** 2, 0.0)

    # Fold (TU, TI) -> (8, 128) with (8,128)-aligned static slices: pure VPU
    # vreg adds (one per vreg of masked_sq), no cross-lane reduce, no relayout.
    tu, ti = masked_sq.shape
    acc_rows = masked_sq[0:8, :]
    for a in range(1, tu // 8):
        acc_rows = acc_rows + masked_sq[a * 8:(a + 1) * 8, :]
    partial = acc_rows[:, 0:128]
    for b in range(1, ti // 128):
        partial = partial + acc_rows[:, b * 128:(b + 1) * 128]

    perr_ref[...] += partial


def pmf_loss(matrix, u_features, v_features, *, tile_u=_TILE_U, tile_i=_TILE_I):
    n_users, n_items = matrix.shape
    k = u_features.shape[1]

    # Tiles: sublane-aligned user tile (multiple of 16 for the bf16 matrix),
    # lane-dense item tile; never larger than the (aligned) problem so toy
    # shapes stay a single grid step.
    tile_u = min(tile_u, _round_up(n_users, 16))
    tile_i = min(tile_i, _round_up(n_items, 128))
    pad_u = _round_up(n_users, tile_u)
    pad_i = _round_up(n_items, tile_i)

    # Ratings as bf16 ({1..5} and -1 are bf16-exact): halves matrix HBM traffic.
    # Skip the padded copy entirely when the input is already tile-aligned.
    # TODO(synk): for repeated loss evaluation, pre-pad/cast the ratings once
    # outside this call to remove the pad pass from the hot path.
    if (n_users, n_items) == (pad_u, pad_i):
        m_p = matrix.astype(jnp.bfloat16)
    else:
        m_p = jnp.full((pad_u, pad_i), -1.0, dtype=jnp.bfloat16)
        m_p = m_p.at[:n_users, :n_items].set(matrix.astype(jnp.bfloat16))

    u_f32 = u_features.astype(jnp.float32)
    v_f32 = v_features.astype(jnp.float32)
    u_p = jnp.zeros((pad_u, k), jnp.float32).at[:n_users].set(u_f32)
    # V pre-transposed to (K, pad_i): lane-dense feature tile for the kernel.
    vt_p = jnp.zeros((k, pad_i), jnp.float32).at[:, :n_items].set(v_f32.T)

    n_ut = pad_u // tile_u
    n_it = pad_i // tile_i

    perr_part = pl.pallas_call(
        _pmf_kernel,
        out_shape=jax.ShapeDtypeStruct((n_ut * 8, 128), jnp.float32),
        grid_spec=pltpu.PrefetchScalarGridSpec(
            num_scalar_prefetch=0,
            grid=(n_ut, n_it),
            in_specs=[
                pl.BlockSpec((tile_u, tile_i), lambda i, j: (i, j)),  # ratings
                pl.BlockSpec((tile_u, k), lambda i, j: (i, 0)),       # U rows
                pl.BlockSpec((k, tile_i), lambda i, j: (0, j)),       # V^T cols
            ],
            out_specs=pl.BlockSpec((8, 128), lambda i, j: (i, 0)),    # perr partials
        ),
        compiler_params=pltpu.CompilerParams(
            dimension_semantics=("parallel", "arbitrary"),
            vmem_limit_bytes=_VMEM_LIMIT,
        ),
    )(m_p, u_p, vt_p)

    # Tiny final reduction over the lane-dense per-user-tile partial sums.
    prediction_error = jnp.sum(perr_part)

    # Regularizers are O((M+N)*K): compute with plain jnp outside the kernel.
    u_reg = LAM_U * jnp.sum(jnp.sqrt(jnp.sum(u_f32 * u_f32, axis=1)))
    v_reg = LAM_V * jnp.sum(jnp.sqrt(jnp.sum(v_f32 * v_f32, axis=1)))
    loss = prediction_error + u_reg + v_reg
    return loss, prediction_error


def pmf_loss_ref(matrix, u_features, v_features):
    non_zero_mask = (matrix != -1).astype(jnp.float32)
    predicted = jax.nn.sigmoid(u_features @ v_features.T)
    diff = (matrix - predicted) ** 2
    prediction_error = jnp.sum(diff * non_zero_mask)
    u_reg = LAM_U * jnp.sum(jnp.linalg.norm(u_features, axis=1))
    v_reg = LAM_V * jnp.sum(jnp.linalg.norm(v_features, axis=1))
    return prediction_error + u_reg + v_reg, prediction_error


if __name__ == "__main__":
    key = jax.random.PRNGKey(0)
    k_r, k_m, k_u, k_v = jax.random.split(key, 4)

    N_USERS, N_ITEMS, K = 16, 32, 8

    # Ratings in {1..5}, with ~40% missing entries marked as -1.
    ratings = jax.random.randint(k_r, (N_USERS, N_ITEMS), 1, 6).astype(jnp.float32)
    missing = jax.random.uniform(k_m, (N_USERS, N_ITEMS)) < 0.4
    matrix = jnp.where(missing, -1.0, ratings)

    u_features = jax.random.normal(k_u, (N_USERS, K), dtype=jnp.float32) * 0.5
    v_features = jax.random.normal(k_v, (N_ITEMS, K), dtype=jnp.float32) * 0.5

    loss, perr = jax.block_until_ready(
        jax.jit(pmf_loss)(matrix, u_features, v_features)
    )
    loss_r, perr_r = pmf_loss_ref(matrix, u_features, v_features)

    assert jnp.allclose(loss, loss_r, rtol=1e-5, atol=1e-4), (loss, loss_r)
    assert jnp.allclose(perr, perr_r, rtol=1e-5, atol=1e-4), (perr, perr_r)

    print("KERNEL_OK")
</pallas_src>

<mosaic_0001>
module attributes {stable_mosaic.version = 11 : i64} {
  func.func @_pmf_kernel(%arg0: i32, %arg1: i32, %arg2: memref<16x128xbf16, #tpu.memory_space<vmem>>, %arg3: memref<16x8xf32, #tpu.memory_space<vmem>>, %arg4: memref<8x128xf32, #tpu.memory_space<vmem>>, %arg5: memref<8x128xf32, #tpu.memory_space<vmem>>) attributes {dimension_semantics = [#tpu.dimension_semantics<parallel>, #tpu.dimension_semantics<arbitrary>], iteration_bounds = array<i64: 1, 1>, scalar_prefetch = 0 : i64, scratch_operands = 0 : i64, tpu.core_type = #tpu.core_type<tc>, window_params = [{transform_indices = @transform_0, window_bounds = array<i64: 16, 128>}, {transform_indices = @transform_1, window_bounds = array<i64: 16, 8>}, {transform_indices = @transform_2, window_bounds = array<i64: 8, 128>}, {transform_indices = @transform_3, window_bounds = array<i64: 8, 128>}]} {
    %c0_i32 = arith.constant 0 : i32
    %0 = arith.cmpi eq, %arg1, %c0_i32 : i32
    %1 = arith.extui %0 : i1 to i32
    %c0_i32_0 = arith.constant 0 : i32
    %2 = arith.cmpi ne, %1, %c0_i32_0 : i32
    scf.if %2 {
      %cst_15 = arith.constant 0.000000e+00 : f32
      %27 = vector.broadcast %cst_15 : f32 to vector<8x128xf32>
      %c0_16 = arith.constant 0 : index
      %c0_17 = arith.constant 0 : index
      %28 = vector.load %arg5[%c0_16, %c0_17] : memref<8x128xf32, #tpu.memory_space<vmem>>, vector<8x128xf32>
      tpu.vector_store %arg5[%c0_16, %c0_17], %27 {strides = array<i32>} : memref<8x128xf32, #tpu.memory_space<vmem>>, vector<8x128xf32>,
    } else {
    }
    %c0 = arith.constant 0 : index
    %c0_1 = arith.constant 0 : index
    %3 = vector.load %arg2[%c0, %c0_1] : memref<16x128xbf16, #tpu.memory_space<vmem>>, vector<16x128xbf16>
    %4 = arith.extf %3 : vector<16x128xbf16> to vector<16x128xf32>
    %c0_2 = arith.constant 0 : index
    %c0_3 = arith.constant 0 : index
    %5 = vector.load %arg3[%c0_2, %c0_3] : memref<16x8xf32, #tpu.memory_space<vmem>>, vector<16x8xf32>
    %c0_4 = arith.constant 0 : index
    %c0_5 = arith.constant 0 : index
    %6 = vector.load %arg4[%c0_4, %c0_5] : memref<8x128xf32, #tpu.memory_space<vmem>>, vector<8x128xf32>
    %cst = arith.constant dense<0.000000e+00> : vector<16x128xf32>
    %7 = tpu.matmul %5, %6, %cst {dimension_numbers = #tpu.dot_dimension_numbers<[1], [0], [0], [1], [0, 0, 1, 1], [], []>} : vector<16x8xf32>, vector<8x128xf32>, vector<16x128xf32> -> vector<16x128xf32>
    %cst_6 = arith.constant 5.000000e-01 : f32
    %8 = vector.broadcast %cst_6 : f32 to vector<16x128xf32>
    %9 = arith.mulf %8, %7 : vector<16x128xf32>
    %10 = math.tanh %9 : vector<16x128xf32>
    %cst_7 = arith.constant 5.000000e-01 : f32
    %11 = vector.broadcast %cst_7 : f32 to vector<16x128xf32>
    %12 = arith.mulf %11, %10 : vector<16x128xf32>
    %cst_8 = arith.constant 5.000000e-01 : f32
    %13 = vector.broadcast %cst_8 : f32 to vector<16x128xf32>
    %14 = arith.addf %12, %13 : vector<16x128xf32>
    %cst_9 = arith.constant -1.000000e+00 : f32
    %15 = vector.broadcast %cst_9 : f32 to vector<16x128xf32>
    %16 = arith.cmpf one, %4, %15 : vector<16x128xf32>
    %17 = arith.subf %4, %14 : vector<16x128xf32>
    %18 = arith.mulf %17, %17 : vector<16x128xf32>
    %cst_10 = arith.constant 0.000000e+00 : f32
    %19 = vector.broadcast %cst_10 : f32 to vector<16x128xf32>
    %20 = arith.select %16, %18, %19 : vector<16x128xi1>, vector<16x128xf32>
    %21 = vector.extract_strided_slice %20 {offsets = [0, 0], sizes = [8, 128], strides = [1, 1]} : vector<16x128xf32> to vector<8x128xf32>
    %22 = vector.extract_strided_slice %20 {offsets = [8, 0], sizes = [8, 128], strides = [1, 1]} : vector<16x128xf32> to vector<8x128xf32>
    %23 = arith.addf %21, %22 : vector<8x128xf32>
    %c0_11 = arith.constant 0 : index
    %c0_12 = arith.constant 0 : index
    %24 = vector.load %arg5[%c0_11, %c0_12] : memref<8x128xf32, #tpu.memory_space<vmem>>, vector<8x128xf32>
    %25 = arith.addf %24, %23 : vector<8x128xf32>
    %c0_13 = arith.constant 0 : index
    %c0_14 = arith.constant 0 : index
    %26 = vector.load %arg5[%c0_13, %c0_14] : memref<8x128xf32, #tpu.memory_space<vmem>>, vector<8x128xf32>
    tpu.vector_store %arg5[%c0_13, %c0_14], %25 {strides = array<i32>} : memref<8x128xf32, #tpu.memory_space<vmem>>, vector<8x128xf32>,
    return
  }
  func.func @transform_0(%arg0: i32, %arg1: i32) -> (i32, i32) {
    %c0_i32 = arith.constant 0 : i32
    return %arg0, %arg1 : i32, i32
  }
  func.func @transform_1(%arg0: i32, %arg1: i32) -> (i32, i32) {
    %c0_i32 = arith.constant 0 : i32
    %c0_i32_0 = arith.constant 0 : i32
    return %arg0, %c0_i32 : i32, i32
  }
  func.func @transform_2(%arg0: i32, %arg1: i32) -> (i32, i32) {
    %c0_i32 = arith.constant 0 : i32
    %c0_i32_0 = arith.constant 0 : i32
    return %c0_i32, %arg1 : i32, i32
  }
  func.func @transform_3(%arg0: i32, %arg1: i32) -> (i32, i32) {
    %c0_i32 = arith.constant 0 : i32
    %c0_i32_0 = arith.constant 0 : i32
    return %arg0, %c0_i32 : i32, i32
  }
}

</mosaic_0001>

<bundles_post_ra>
// kernel: pmf_loss.1
= control target key start
LH: loop header
LB: loop body
LE: loop exit
PB: predicated region body
PF: predicated region fallthrough
CT: control target
= control target key end

     0   :  { %vm26_vm0 = vcmask 64512   ;;  %s186_s2 = inlined_call_operand.vmem [shape: f32[8,128], index: 2, kind: input, shape index: {}]   ;;  %s187_s1 = inlined_call_operand.vmem [shape: f32[16,8], index: 1, kind: input, shape index: {}]   ;;  %s188_s0 = inlined_call_operand.vmem [shape: bf16[16,128], index: 0, kind: input, shape index: {}]   ;;  %s189_s3 = inlined_call_operand.vmem [shape: f32[8,128], index: 3, kind: output, shape index: {}]  }
   0x1   :  { %v25_v0 = vld [vmem:[%s186_s2] sm:$0xff]  ;;  %v24_v2 = vld [vmem:[%s187_s1 + $0x8] sm:$0xff] }
   0x2   :  { %v23_v1 = vld [vmem:[%s187_s1] sm:$0xff]  ;;  %141 = vmatprep.subr.mxu0 %v25_v0 }
   0x3   :  { %143 = vmatprep.mubr.msk.f32.mxu0 %vm26_vm0, %v23_v1  ;;  %142 = vmatpush3.msra.mxu0 %v25_v0  ;;  %v135_v7 = vld [vmem:[%s188_s0] sm:$0xff]  }
   0x4   :  { %144 = vmatmul.mubr.msk.f32.vlgmr.msra.gmra.mrb[0].mxu0 %vm26_vm0, %v24_v2  ;;  %v137_v10 = vunpack.c.h.bf16 %v135_v7  ;;  %v136_v12 = vunpack.c.l.bf16 %v135_v7 }
   0x6   :  { %vm117_vm1 = vcmp.ne.f32.partialorder %v137_v10, -1.0  ;;  %vm116_vm2 = vcmp.ne.f32.partialorder %v136_v12, -1.0 }
  0xd7   :  { %v145_v3 = vpop.f32.mrb[0].mxu0 }
  0xd8   :  { %v109_v4 = vmul.f32 0.5, %v145_v3  ;;  %v99_v5 = vpop.f32.mrb[1].mxu0 }
  0xd9   :  { %v108_v6 = vmul.f32 0.5, %v99_v5 }
  0xda   :  { %147 = vtanh.f32 %v109_v4 }
  0xdb   :  { %149 = vtanh.f32 %v108_v6 }
  0xe4   :  { %v148_v8 = vpop.eup %147 }
  0xe5   :  { %v150_v9 = vpop.eup %149  ;;  %v113_v11 = vmul.f32 0.5, %v148_v8 }
  0xe6   :  { %v112_v13 = vmul.f32 0.5, %v150_v9 }
  0xe7   :  { %v115_v14 = vadd.f32 0.5, %v113_v11 }
  0xe8   :  { %v114_v15 = vadd.f32 0.5, %v112_v13 }
  0xe9   :  { %v119_v16 = vsub.f32 %v137_v10, %v115_v14 }
  0xea   :  { %v118_v17 = vsub.f32 %v136_v12, %v114_v15 }
  0xeb   :  { %v121_v18 = vmul.f32 %v119_v16, %v119_v16 }
  0xec   :  { %v120_v19 = vmul.f32 %v118_v17, %v118_v17 }
  0xed   :  { %v123_v20 = vsel %vm117_vm1, %v121_v18, 0.0 }
  0xee   :  { %v122_v21 = vsel %vm116_vm2, %v120_v19, 0.0 }
  0xef   :  { %v124_v22 = vadd.f32 %v123_v20, %v122_v21 }
  0xf1   :  { %127 = vst [vmem:[%s189_s3] sm:$0xff] %v124_v22 }

</bundles_post_ra>
